<compile_context>
chip_gen: v7x
topology: tpu7x:2x2x1
jax: 0.10.0
libtpu: 0.0.40
codegen_flags: <defaults>
</compile_context>

<pallas_src>
import jax
import jax.numpy as jnp
from jax.experimental import pallas as pl
from jax.experimental.pallas import tpu as pltpu

IN_FEATURES = 4
HIDDEN = 16
NUM_CLASSES = 3
C_PAD = 8            # classes padded to one full sublane group for unmasked stores
LANE = 128

# Packed parameter slab layout (rows x cols), f32:
#   rows  0:16, cols 0:4   -> W1 (hidden, in)      rows  0:16, col 16 -> b1
#   rows 16:32, cols 0:16  -> W2 (hidden, hidden)  rows 16:32, col 16 -> b2
#   rows 32:40, cols 0:16  -> W3 padded (8, hidden) rows 32:40, col 16 -> b3 padded
_W1_R0, _W2_R0, _W3_R0 = 0, HIDDEN, 2 * HIDDEN
_BIAS_COL = HIDDEN
_SLAB_ROWS = 2 * HIDDEN + C_PAD          # 40
_SLAB_COLS = 24


def iris_mlp_kernel(xt_ref, p_ref, ot_ref):
    # xt_ref: (IN_FEATURES, TM)  p_ref: (40, 24)  ot_ref: (C_PAD, TM)
    xt = xt_ref[...]

    w1 = p_ref[_W1_R0:_W1_R0 + HIDDEN, 0:IN_FEATURES]              # (16, 4)
    b1 = p_ref[_W1_R0:_W1_R0 + HIDDEN, _BIAS_COL:_BIAS_COL + 1]    # (16, 1)
    w2 = p_ref[_W2_R0:_W2_R0 + HIDDEN, 0:HIDDEN]                   # (16, 16)
    b2 = p_ref[_W2_R0:_W2_R0 + HIDDEN, _BIAS_COL:_BIAS_COL + 1]    # (16, 1)
    w3 = p_ref[_W3_R0:_W3_R0 + C_PAD, 0:HIDDEN]                    # (8, 16), rows 3.. are zero
    b3 = p_ref[_W3_R0:_W3_R0 + C_PAD, _BIAS_COL:_BIAS_COL + 1]     # (8, 1),  rows 3.. are zero

    # fc1 + ReLU (dropout is identity at inference)
    h1 = jnp.maximum(jnp.dot(w1, xt, preferred_element_type=jnp.float32) + b1, 0.0)
    # fc2 + ReLU
    h2 = jnp.maximum(jnp.dot(w2, h1, preferred_element_type=jnp.float32) + b2, 0.0)
    # fc3 (logits); padded class rows stay zero and are sliced off in the wrapper
    out = jnp.dot(w3, h2, preferred_element_type=jnp.float32) + b3
    ot_ref[...] = out.astype(ot_ref.dtype)


def pack_params(params):
    """Pack PyTorch-convention params (W: (out,in), b: (out,)) into one f32 slab."""
    slab = jnp.zeros((_SLAB_ROWS, _SLAB_COLS), jnp.float32)
    slab = slab.at[_W1_R0:_W1_R0 + HIDDEN, 0:IN_FEATURES].set(params["w1"])
    slab = slab.at[_W1_R0:_W1_R0 + HIDDEN, _BIAS_COL].set(params["b1"])
    slab = slab.at[_W2_R0:_W2_R0 + HIDDEN, 0:HIDDEN].set(params["w2"])
    slab = slab.at[_W2_R0:_W2_R0 + HIDDEN, _BIAS_COL].set(params["b2"])
    slab = slab.at[_W3_R0:_W3_R0 + NUM_CLASSES, 0:HIDDEN].set(params["w3"])
    slab = slab.at[_W3_R0:_W3_R0 + NUM_CLASSES, _BIAS_COL].set(params["b3"])
    return slab


def _round_up(n, m):
    return ((n + m - 1) // m) * m


@jax.jit
def iris_classifier_forward(x, params):
    """x: (B, 4) float32; params: PyTorch-convention weights/biases. Returns (B, 3) logits."""
    B = x.shape[0]
    tm = 512 if B >= 512 else _round_up(max(B, 1), LANE)
    b_pad = _round_up(B, tm)

    # Batch-on-lanes: transpose + zero-pad batch up to a lane-tile multiple.
    xt = jnp.zeros((IN_FEATURES, b_pad), jnp.float32).at[:, :B].set(x.T)
    slab = pack_params(params)

    flops = 2 * b_pad * (IN_FEATURES * HIDDEN + HIDDEN * HIDDEN + HIDDEN * C_PAD)
    bytes_accessed = 4 * (xt.size + slab.size + C_PAD * b_pad)

    out_t = pl.pallas_call(
        iris_mlp_kernel,
        out_shape=jax.ShapeDtypeStruct((C_PAD, b_pad), jnp.float32),
        grid=(b_pad // tm,),
        in_specs=[
            # activations: batch tiles on the lane axis, pipelined across the grid
            pl.BlockSpec((IN_FEATURES, tm), lambda i: (0, i)),
            # packed params: constant block index -> fetched once, VMEM-resident
            pl.BlockSpec((_SLAB_ROWS, _SLAB_COLS), lambda i: (0, 0)),
        ],
        out_specs=pl.BlockSpec((C_PAD, tm), lambda i: (0, i)),
        compiler_params=pltpu.CompilerParams(
            dimension_semantics=("parallel",)),
        cost_estimate=pl.CostEstimate(
            flops=flops, transcendentals=0, bytes_accessed=bytes_accessed),
    )(xt, slab)

    return out_t[:NUM_CLASSES, :B].T


def init_params(key, input_size=IN_FEATURES, hidden_size=HIDDEN, num_classes=NUM_CLASSES):
    """Deterministic init mimicking PyTorch nn.Linear default (uniform +-1/sqrt(fan_in))."""
    def linear(k, fan_in, fan_out):
        kw, kb = jax.random.split(k)
        bound = 1.0 / jnp.sqrt(float(fan_in))
        w = jax.random.uniform(kw, (fan_out, fan_in), jnp.float32, -bound, bound)
        b = jax.random.uniform(kb, (fan_out,), jnp.float32, -bound, bound)
        return w, b

    k1, k2, k3 = jax.random.split(key, 3)
    w1, b1 = linear(k1, input_size, hidden_size)
    w2, b2 = linear(k2, hidden_size, hidden_size)
    w3, b3 = linear(k3, hidden_size, num_classes)
    return {"w1": w1, "b1": b1, "w2": w2, "b2": b2, "w3": w3, "b3": b3}


def _reference(x, params):
    h = jnp.maximum(x @ params["w1"].T + params["b1"], 0.0)
    h = jnp.maximum(h @ params["w2"].T + params["b2"], 0.0)
    return h @ params["w3"].T + params["b3"]


if __name__ == "__main__":
    key = jax.random.PRNGKey(0)
    key_x, key_p = jax.random.split(key)

    # Small batch (matches the Iris spec: 4 input features, 16 hidden, 3 classes).
    batch = 8
    x = jax.random.normal(key_x, (batch, IN_FEATURES), dtype=jnp.float32)
    params = init_params(key_p)

    logits = iris_classifier_forward(x, params)
    jax.block_until_ready(logits)
    ref = _reference(x, params)
    assert logits.shape == (batch, NUM_CLASSES)
    assert jnp.allclose(logits, ref, atol=1e-4, rtol=1e-4), "mismatch vs reference"

    # Larger batch exercises the multi-step pipelined grid path (TM=512, grid=(2,)).
    big_batch = 1024
    xb = jax.random.normal(key_x, (big_batch, IN_FEATURES), dtype=jnp.float32)
    logits_b = iris_classifier_forward(xb, params)
    jax.block_until_ready(logits_b)
    ref_b = _reference(xb, params)
    assert logits_b.shape == (big_batch, NUM_CLASSES)
    assert jnp.allclose(logits_b, ref_b, atol=1e-4, rtol=1e-4), "mismatch vs reference (big batch)"

    print("KERNEL_OK")
</pallas_src>

<mosaic_0001>
module attributes {stable_mosaic.version = 11 : i64} {
  func.func @iris_mlp_kernel(%arg0: i32, %arg1: memref<4x128xf32, #tpu.memory_space<vmem>>, %arg2: memref<40x24xf32, #tpu.memory_space<vmem>>, %arg3: memref<8x128xf32, #tpu.memory_space<vmem>>) attributes {dimension_semantics = [#tpu.dimension_semantics<parallel>], iteration_bounds = array<i64: 1>, scalar_prefetch = 0 : i64, scratch_operands = 0 : i64, tpu.core_type = #tpu.core_type<tc>, window_params = [{transform_indices = @transform_0, window_bounds = array<i64: 4, 128>}, {pipeline_mode = #tpu.pipeline_mode<synchronous>, transform_indices = @transform_1, window_bounds = array<i64: 40, 24>}, {transform_indices = @transform_2, window_bounds = array<i64: 8, 128>}]} {
    %c0 = arith.constant 0 : index
    %c0_0 = arith.constant 0 : index
    %0 = vector.load %arg1[%c0, %c0_0] : memref<4x128xf32, #tpu.memory_space<vmem>>, vector<4x128xf32>
    %c0_1 = arith.constant 0 : index
    %c0_2 = arith.constant 0 : index
    %1 = vector.load %arg2[%c0_1, %c0_2] : memref<40x24xf32, #tpu.memory_space<vmem>>, vector<16x4xf32>
    %c0_3 = arith.constant 0 : index
    %c16 = arith.constant 16 : index
    %2 = vector.load %arg2[%c0_3, %c16] : memref<40x24xf32, #tpu.memory_space<vmem>>, vector<16x1xf32>
    %c16_4 = arith.constant 16 : index
    %c0_5 = arith.constant 0 : index
    %3 = vector.load %arg2[%c16_4, %c0_5] : memref<40x24xf32, #tpu.memory_space<vmem>>, vector<16x16xf32>
    %c16_6 = arith.constant 16 : index
    %c16_7 = arith.constant 16 : index
    %4 = vector.load %arg2[%c16_6, %c16_7] : memref<40x24xf32, #tpu.memory_space<vmem>>, vector<16x1xf32>
    %c32 = arith.constant 32 : index
    %c0_8 = arith.constant 0 : index
    %5 = vector.load %arg2[%c32, %c0_8] : memref<40x24xf32, #tpu.memory_space<vmem>>, vector<8x16xf32>
    %c32_9 = arith.constant 32 : index
    %c16_10 = arith.constant 16 : index
    %6 = vector.load %arg2[%c32_9, %c16_10] : memref<40x24xf32, #tpu.memory_space<vmem>>, vector<8x1xf32>
    %cst = arith.constant dense<0.000000e+00> : vector<16x128xf32>
    %7 = tpu.matmul %1, %0, %cst {dimension_numbers = #tpu.dot_dimension_numbers<[1], [0], [0], [1], [0, 0, 1, 1], [], []>} : vector<16x4xf32>, vector<4x128xf32>, vector<16x128xf32> -> vector<16x128xf32>
    %8 = vector.broadcast %2 : vector<16x1xf32> to vector<16x128xf32>
    %9 = arith.addf %7, %8 : vector<16x128xf32>
    %cst_11 = arith.constant 0.000000e+00 : f32
    %10 = vector.broadcast %cst_11 : f32 to vector<16x128xf32>
    %11 = arith.maximumf %9, %10 : vector<16x128xf32>
    %cst_12 = arith.constant dense<0.000000e+00> : vector<16x128xf32>
    %12 = tpu.matmul %3, %11, %cst_12 {dimension_numbers = #tpu.dot_dimension_numbers<[1], [0], [0], [1], [0, 0, 1, 1], [], []>} : vector<16x16xf32>, vector<16x128xf32>, vector<16x128xf32> -> vector<16x128xf32>
    %13 = vector.broadcast %4 : vector<16x1xf32> to vector<16x128xf32>
    %14 = arith.addf %12, %13 : vector<16x128xf32>
    %cst_13 = arith.constant 0.000000e+00 : f32
    %15 = vector.broadcast %cst_13 : f32 to vector<16x128xf32>
    %16 = arith.maximumf %14, %15 : vector<16x128xf32>
    %cst_14 = arith.constant dense<0.000000e+00> : vector<8x128xf32>
    %17 = tpu.matmul %5, %16, %cst_14 {dimension_numbers = #tpu.dot_dimension_numbers<[1], [0], [0], [1], [0, 0, 1, 1], [], []>} : vector<8x16xf32>, vector<16x128xf32>, vector<8x128xf32> -> vector<8x128xf32>
    %18 = vector.broadcast %6 : vector<8x1xf32> to vector<8x128xf32>
    %19 = arith.addf %17, %18 : vector<8x128xf32>
    %c0_15 = arith.constant 0 : index
    %c0_16 = arith.constant 0 : index
    %20 = vector.load %arg3[%c0_15, %c0_16] : memref<8x128xf32, #tpu.memory_space<vmem>>, vector<8x128xf32>
    tpu.vector_store %arg3[%c0_15, %c0_16], %19 {strides = array<i32>} : memref<8x128xf32, #tpu.memory_space<vmem>>, vector<8x128xf32>,
    return
  }
  func.func @transform_0(%arg0: i32) -> (i32, i32) {
    %c0_i32 = arith.constant 0 : i32
    %c0_i32_0 = arith.constant 0 : i32
    return %c0_i32, %arg0 : i32, i32
  }
  func.func @transform_1(%arg0: i32) -> (i32, i32) {
    %c0_i32 = arith.constant 0 : i32
    %c0_i32_0 = arith.constant 0 : i32
    %c0_i32_1 = arith.constant 0 : i32
    return %c0_i32, %c0_i32_0 : i32, i32
  }
  func.func @transform_2(%arg0: i32) -> (i32, i32) {
    %c0_i32 = arith.constant 0 : i32
    %c0_i32_0 = arith.constant 0 : i32
    return %c0_i32, %arg0 : i32, i32
  }
}

</mosaic_0001>

<bundles_post_ra>
// kernel: iris_classifier_forward.1
= control target key start
LH: loop header
LB: loop body
LE: loop exit
PB: predicated region body
PF: predicated region fallthrough
CT: control target
= control target key end

     0   :  { %vm32_vm0 = vcmask 1043456   ;;  %vm27_vm1 = vcmask 31744   ;;  %v335_v3 = vmov 16   ;;  %vm123_vm2 = vcmask 130048   ;;  %s378_s0 = inlined_call_operand.vmem [shape: f32[4,128], index: 0, kind: input, shape index: {}]   ;;  %s379_s1 = inlined_call_operand.vmem [shape: f32[40,24], index: 1, kind: input, shape index: {}]   ;;  %s380_s2 = inlined_call_operand.vmem [shape: f32[8,128], index: 2, kind: output, shape index: {}]  }
   0x1   :  { %v11_v0 = vld [vmem:[%s378_s0] sm:$0xf]  ;;  %v13_v2 = vld [vmem:[%s379_s1 + $0x8] sm:$0xff]  ;;  %333 = vset.pattern.permute.xlu0 %v335_v3  ;;  %334 = vset.pattern.permute.xlu1 %v335_v3  ;;  %v14_v5 = vld [vmem:[%s379_s1 + $0x10] sm:$0xff]  ;;  %v336_v16 = vmov 0.0|0.0   ;;  %vm337_vm3 = vmmov 0  }
   0x2   :  { %v12_v1 = vld [vmem:[%s379_s1] sm:$0xff]  ;;  %303 = vmatprep.subr.msk.mxu0 %vm32_vm0, %v11_v0  ;;  %312 = vmatprep.mubr.msk.f32.mxu1 %vm123_vm2, %v14_v5  ;;  %v15_v6 = vld [vmem:[%s379_s1 + $0x18] sm:$0xff]  ;;  %v338_v17 = vmov 0.0  }
   0x3   :  { %305 = vmatprep.mubr.msk.f32.mxu0 %vm27_vm1, %v12_v1  ;;  %304 = vmatpush3.msk.msra.mxu0 %vm32_vm0, %v11_v0  ;;  %v16_v4 = vld [vmem:[%s379_s1 + $0x20] sm:$0xff] }
   0x4   :  { %19 = vperm.xlu0 %333, %v12_v1   ;;  %306 = vmatmul.mubr.msk.f32.vlgmr.msra.gmra.mrb[0].mxu0 %vm27_vm1, %v13_v2 }
   0x5   :  { %115 = vperm.xlu1 %334, %v14_v5   ;;  %326 = vmatprep.subr.bf16.mxu0 %v336_v16 }
   0x6   :  { %319 = vmatprep.mubr.msk.f32.mxu0 %vm337_vm3, %v338_v17 }
   0x8   :  { %24 = vperm.xlu0 %333, %v13_v2  }
   0x9   :  { %120 = vperm.xlu1 %334, %v15_v6  }
   0xc   :  { %207 = vperm.xlu0 %333, %v16_v4  }
  0x83   :  { %v20_v7 = vpop.permute.xlu0 %19 }
  0x84   :  { %v116_v18 = vpop.permute.xlu1 %115 }
  0x87   :  { %v25_v8 = vpop.permute.xlu0 %24 }
  0x88   :  { %v121_v19 = vpop.permute.xlu1 %120 }
  0x8b   :  { %v208_v27 = vpop.permute.xlu0 %207 }
  0xd7   :  { %v307_v9 = vpop.f32.mrb[0].mxu0 }
  0xd8   :  { %v108_v10 = vadd.f32 %v307_v9, %v25_v8  ;;  %v102_v11 = vpop.f32.mrb[1].mxu0 }
  0xd9   :  { %v103_v12 = vadd.f32 %v102_v11, %v20_v7 }
  0xda   :  { %v112_v13 = vmax.f32 %v108_v10, 0.0 }
  0xdb   :  { %v111_v14 = vmax.f32 %v103_v12, 0.0 }
  0xdd   :  { %v322_v15 = vpack.c.bf16 %v112_v13, %v111_v14 }
  0xdf   :  { %323 = vmatprep.subr.bf16.mxu1 %v322_v15 }
  0xe0   :  { %325 = vmatpush3.bf16.msra.mxu1 %v322_v15 }
  0xe3   :  { %313 = vmatmul.mubr.msk.f32.vlgmr.msra.gmra.mrb[0].mxu1 %vm123_vm2, %v15_v6 }
 0x1b6   :  { %v314_v20 = vpop.f32.mrb[0].mxu1 }
 0x1b7   :  { %v200_v21 = vadd.f32 %v314_v20, %v121_v19  ;;  %v194_v22 = vpop.f32.mrb[1].mxu1 }
 0x1b8   :  { %v195_v23 = vadd.f32 %v194_v22, %v116_v18 }
 0x1b9   :  { %v204_v24 = vmax.f32 %v200_v21, 0.0 }
 0x1ba   :  { %v203_v25 = vmax.f32 %v195_v23, 0.0 }
 0x1bc   :  { %v327_v26 = vpack.c.bf16 %v204_v24, %v203_v25 }
 0x1be   :  { %328 = vmatpush3.bf16.msra.mxu0 %v327_v26 }
 0x1c1   :  { %320 = vmatmul.mubr.msk.f32.vlgmr.msra.gmra.mrb[2].mxu0 %vm123_vm2, %v16_v4 }
 0x294   :  { %v278_v28 = vpop.f32.mrb[2].mxu0 }
 0x295   :  { %v279_v29 = vadd.f32 %v278_v28, %v208_v27  ;;  %v321_v30 = vpop.f32.mrb[3].mxu0 }
 0x297   :  { %282 = vst [vmem:[%s380_s2] sm:$0xff] %v279_v29 }

</bundles_post_ra>
